<compile_context>
chip_gen: v6e
topology: v6e:2x2x1
jax: 0.10.0
libtpu: 0.0.40
codegen_flags: <defaults>
</compile_context>

<pallas_src>
import jax
import jax.numpy as jnp
from jax.experimental import pallas as pl
from jax.experimental.pallas import tpu as pltpu

IN_DIM = 16
HIDDEN = 128
OUT_DIM = 60
OUT_PAD = 64  # output padded to 64 lanes (halves writeback vs 128-wide f32)


def _cdiv(a, b):
    return -(-a // b)


def _round_up(a, b):
    return _cdiv(a, b) * b


def mlp_kernel(x_ref,
               w1_ref, b1_ref,
               w2_ref, b2_ref,
               w3_ref, b3_ref,
               w4_ref, b4_ref,
               o_ref):
    # All-f32 path: MXU matmuls with f32 accumulation, VPU bias-add + ReLU in f32.
    h = jnp.dot(x_ref[...], w1_ref[...], preferred_element_type=jnp.float32) + b1_ref[...]
    h = jnp.maximum(h, 0.0)

    h = jnp.dot(h, w2_ref[...], preferred_element_type=jnp.float32) + b2_ref[...]
    h = jnp.maximum(h, 0.0)

    h = jnp.dot(h, w3_ref[...], preferred_element_type=jnp.float32) + b3_ref[...]
    h = jnp.maximum(h, 0.0)

    o_ref[...] = (jnp.dot(h, w4_ref[...], preferred_element_type=jnp.float32)
                  + b4_ref[...])


def mlp_forward(x, params, *, tb=2048):
    """x: (B, 16) float32; params as produced by init_linear (W stored [in, out])."""
    (w1, b1), (w2, b2), (w3, b3), (w4, b4) = params
    B = x.shape[0]

    # ---- Batch tiling -------------------------------------------------------
    # Tiles are multiples of 16 rows; choose the tile count so that tail padding
    # is minimal and TB stays near `tb`. For big batches keep >= 2 tiles so the
    # "parallel" batch axis can shard across both v7x TensorCores.
    B16 = _round_up(max(B, 1), 16)
    n_tiles = _cdiv(B16, _round_up(tb, 16))
    if n_tiles == 1 and B16 >= 512:
        n_tiles = 2
    TB = _round_up(_cdiv(B16, n_tiles), 16)
    B_pad = n_tiles * TB

    # ---- Wrapper-side prep (layout plumbing only; no cast / K-pad of x) ------
    if B_pad != B:
        x = jnp.pad(x, ((0, B_pad - B), (0, 0)))
    w4p = jnp.pad(w4, ((0, 0), (0, OUT_PAD - OUT_DIM)))
    b4p = jnp.pad(b4, ((0, 0), (0, OUT_PAD - OUT_DIM)))

    grid = (n_tiles,)

    def batch_spec(cols):
        return pl.BlockSpec((TB, cols), lambda i: (i, 0))

    def resident_spec(shape):
        return pl.BlockSpec(shape, lambda i: (0, 0))

    flops = 2 * B_pad * (IN_DIM * HIDDEN + HIDDEN * HIDDEN * 2 + HIDDEN * OUT_PAD)
    bytes_accessed = (
        B_pad * IN_DIM * 4                      # x stream in
        + B_pad * OUT_PAD * 4                   # logits stream out
        + (w1.size + w2.size + w3.size + w4p.size) * 4   # resident weights (once)
        + (b1.size + b2.size + b3.size + b4p.size) * 4)  # resident biases (once)

    out = pl.pallas_call(
        mlp_kernel,
        out_shape=jax.ShapeDtypeStruct((B_pad, OUT_PAD), jnp.float32),
        grid=grid,
        in_specs=[
            batch_spec(IN_DIM),
            resident_spec(w1.shape), resident_spec(b1.shape),
            resident_spec(w2.shape), resident_spec(b2.shape),
            resident_spec(w3.shape), resident_spec(b3.shape),
            resident_spec(w4p.shape), resident_spec(b4p.shape),
        ],
        out_specs=batch_spec(OUT_PAD),
        compiler_params=pltpu.CompilerParams(
            dimension_semantics=("parallel",)),
        cost_estimate=pl.CostEstimate(
            flops=flops, transcendentals=0, bytes_accessed=bytes_accessed),
    )(x, w1, b1, w2, b2, w3, b3, w4p, b4p)

    return out[:B, :OUT_DIM]


def init_linear(key, in_features, out_features):
    # Match PyTorch nn.Linear default init: U(-1/sqrt(in), 1/sqrt(in)) for W and b.
    kw, kb = jax.random.split(key)
    bound = 1.0 / jnp.sqrt(float(in_features))
    # Stored as [in, out] (transposed vs. PyTorch's [out, in]) so kernel does x @ W.
    w = jax.random.uniform(kw, (in_features, out_features), jnp.float32,
                           minval=-bound, maxval=bound)
    b = jax.random.uniform(kb, (1, out_features), jnp.float32,
                           minval=-bound, maxval=bound)
    return w, b


def ref_forward(x, params):
    # Plain f32 reference matching the PyTorch module's forward.
    h = x
    for i, (w, b) in enumerate(params):
        h = jnp.dot(h, w, preferred_element_type=jnp.float32) + b
        if i < 3:
            h = jnp.maximum(h, 0.0)
    return h


if __name__ == "__main__":
    key = jax.random.PRNGKey(0)
    k_x, k1, k2, k3, k4 = jax.random.split(key, 5)

    batch = 8
    x = jax.random.normal(k_x, (batch, IN_DIM), jnp.float32)

    params = (
        init_linear(k1, IN_DIM, HIDDEN),
        init_linear(k2, HIDDEN, HIDDEN),
        init_linear(k3, HIDDEN, HIDDEN),
        init_linear(k4, HIDDEN, OUT_DIM),
    )

    out = mlp_forward(x, params)
    jax.block_until_ready(out)

    ref = ref_forward(x, params)
    assert out.shape == (batch, OUT_DIM)
    assert jnp.allclose(out, ref, atol=1e-3, rtol=1e-3), (
        float(jnp.max(jnp.abs(out - ref))))

    print("KERNEL_OK")
</pallas_src>

<mosaic_0001>
module attributes {stable_mosaic.version = 11 : i64} {
  func.func @mlp_kernel(%arg0: i32, %arg1: memref<16x16xf32, #tpu.memory_space<vmem>>, %arg2: memref<16x128xf32, #tpu.memory_space<vmem>>, %arg3: memref<1x128xf32, #tpu.memory_space<vmem>>, %arg4: memref<128x128xf32, #tpu.memory_space<vmem>>, %arg5: memref<1x128xf32, #tpu.memory_space<vmem>>, %arg6: memref<128x128xf32, #tpu.memory_space<vmem>>, %arg7: memref<1x128xf32, #tpu.memory_space<vmem>>, %arg8: memref<128x64xf32, #tpu.memory_space<vmem>>, %arg9: memref<1x64xf32, #tpu.memory_space<vmem>>, %arg10: memref<16x64xf32, #tpu.memory_space<vmem>>) attributes {dimension_semantics = [#tpu.dimension_semantics<parallel>], iteration_bounds = array<i64: 1>, scalar_prefetch = 0 : i64, scratch_operands = 0 : i64, tpu.core_type = #tpu.core_type<tc>, window_params = [{transform_indices = @transform_0, window_bounds = array<i64: 16, 16>}, {pipeline_mode = #tpu.pipeline_mode<synchronous>, transform_indices = @transform_1, window_bounds = array<i64: 16, 128>}, {pipeline_mode = #tpu.pipeline_mode<synchronous>, transform_indices = @transform_2, window_bounds = array<i64: 1, 128>}, {pipeline_mode = #tpu.pipeline_mode<synchronous>, transform_indices = @transform_3, window_bounds = array<i64: 128, 128>}, {pipeline_mode = #tpu.pipeline_mode<synchronous>, transform_indices = @transform_4, window_bounds = array<i64: 1, 128>}, {pipeline_mode = #tpu.pipeline_mode<synchronous>, transform_indices = @transform_5, window_bounds = array<i64: 128, 128>}, {pipeline_mode = #tpu.pipeline_mode<synchronous>, transform_indices = @transform_6, window_bounds = array<i64: 1, 128>}, {pipeline_mode = #tpu.pipeline_mode<synchronous>, transform_indices = @transform_7, window_bounds = array<i64: 128, 64>}, {pipeline_mode = #tpu.pipeline_mode<synchronous>, transform_indices = @transform_8, window_bounds = array<i64: 1, 64>}, {transform_indices = @transform_9, window_bounds = array<i64: 16, 64>}]} {
    %c0 = arith.constant 0 : index
    %c0_0 = arith.constant 0 : index
    %0 = vector.load %arg1[%c0, %c0_0] : memref<16x16xf32, #tpu.memory_space<vmem>>, vector<16x16xf32>
    %c0_1 = arith.constant 0 : index
    %c0_2 = arith.constant 0 : index
    %1 = vector.load %arg2[%c0_1, %c0_2] : memref<16x128xf32, #tpu.memory_space<vmem>>, vector<16x128xf32>
    %cst = arith.constant dense<0.000000e+00> : vector<16x128xf32>
    %2 = tpu.matmul %0, %1, %cst {dimension_numbers = #tpu.dot_dimension_numbers<[1], [0], [0], [1], [0, 0, 1, 1], [], []>} : vector<16x16xf32>, vector<16x128xf32>, vector<16x128xf32> -> vector<16x128xf32>
    %c0_3 = arith.constant 0 : index
    %c0_4 = arith.constant 0 : index
    %3 = vector.load %arg3[%c0_3, %c0_4] : memref<1x128xf32, #tpu.memory_space<vmem>>, vector<1x128xf32>
    %4 = vector.broadcast %3 : vector<1x128xf32> to vector<16x128xf32>
    %5 = arith.addf %2, %4 : vector<16x128xf32>
    %cst_5 = arith.constant 0.000000e+00 : f32
    %6 = vector.broadcast %cst_5 : f32 to vector<16x128xf32>
    %7 = arith.maximumf %5, %6 : vector<16x128xf32>
    %c0_6 = arith.constant 0 : index
    %c0_7 = arith.constant 0 : index
    %8 = vector.load %arg4[%c0_6, %c0_7] : memref<128x128xf32, #tpu.memory_space<vmem>>, vector<128x128xf32>
    %cst_8 = arith.constant dense<0.000000e+00> : vector<16x128xf32>
    %9 = tpu.matmul %7, %8, %cst_8 {dimension_numbers = #tpu.dot_dimension_numbers<[1], [0], [0], [1], [0, 0, 1, 1], [], []>} : vector<16x128xf32>, vector<128x128xf32>, vector<16x128xf32> -> vector<16x128xf32>
    %c0_9 = arith.constant 0 : index
    %c0_10 = arith.constant 0 : index
    %10 = vector.load %arg5[%c0_9, %c0_10] : memref<1x128xf32, #tpu.memory_space<vmem>>, vector<1x128xf32>
    %11 = vector.broadcast %10 : vector<1x128xf32> to vector<16x128xf32>
    %12 = arith.addf %9, %11 : vector<16x128xf32>
    %cst_11 = arith.constant 0.000000e+00 : f32
    %13 = vector.broadcast %cst_11 : f32 to vector<16x128xf32>
    %14 = arith.maximumf %12, %13 : vector<16x128xf32>
    %c0_12 = arith.constant 0 : index
    %c0_13 = arith.constant 0 : index
    %15 = vector.load %arg6[%c0_12, %c0_13] : memref<128x128xf32, #tpu.memory_space<vmem>>, vector<128x128xf32>
    %cst_14 = arith.constant dense<0.000000e+00> : vector<16x128xf32>
    %16 = tpu.matmul %14, %15, %cst_14 {dimension_numbers = #tpu.dot_dimension_numbers<[1], [0], [0], [1], [0, 0, 1, 1], [], []>} : vector<16x128xf32>, vector<128x128xf32>, vector<16x128xf32> -> vector<16x128xf32>
    %c0_15 = arith.constant 0 : index
    %c0_16 = arith.constant 0 : index
    %17 = vector.load %arg7[%c0_15, %c0_16] : memref<1x128xf32, #tpu.memory_space<vmem>>, vector<1x128xf32>
    %18 = vector.broadcast %17 : vector<1x128xf32> to vector<16x128xf32>
    %19 = arith.addf %16, %18 : vector<16x128xf32>
    %cst_17 = arith.constant 0.000000e+00 : f32
    %20 = vector.broadcast %cst_17 : f32 to vector<16x128xf32>
    %21 = arith.maximumf %19, %20 : vector<16x128xf32>
    %c0_18 = arith.constant 0 : index
    %c0_19 = arith.constant 0 : index
    %22 = vector.load %arg8[%c0_18, %c0_19] : memref<128x64xf32, #tpu.memory_space<vmem>>, vector<128x64xf32>
    %cst_20 = arith.constant dense<0.000000e+00> : vector<16x64xf32>
    %23 = tpu.matmul %21, %22, %cst_20 {dimension_numbers = #tpu.dot_dimension_numbers<[1], [0], [0], [1], [0, 0, 1, 1], [], []>} : vector<16x128xf32>, vector<128x64xf32>, vector<16x64xf32> -> vector<16x64xf32>
    %c0_21 = arith.constant 0 : index
    %c0_22 = arith.constant 0 : index
    %24 = vector.load %arg9[%c0_21, %c0_22] : memref<1x64xf32, #tpu.memory_space<vmem>>, vector<1x64xf32>
    %25 = vector.broadcast %24 : vector<1x64xf32> to vector<16x64xf32>
    %26 = arith.addf %23, %25 : vector<16x64xf32>
    %c0_23 = arith.constant 0 : index
    %c0_24 = arith.constant 0 : index
    %27 = vector.load %arg10[%c0_23, %c0_24] : memref<16x64xf32, #tpu.memory_space<vmem>>, vector<16x64xf32>
    tpu.vector_store %arg10[%c0_23, %c0_24], %26 {strides = array<i32>} : memref<16x64xf32, #tpu.memory_space<vmem>>, vector<16x64xf32>,
    return
  }
  func.func @transform_0(%arg0: i32) -> (i32, i32) {
    %c0_i32 = arith.constant 0 : i32
    %c0_i32_0 = arith.constant 0 : i32
    return %arg0, %c0_i32 : i32, i32
  }
  func.func @transform_1(%arg0: i32) -> (i32, i32) {
    %c0_i32 = arith.constant 0 : i32
    %c0_i32_0 = arith.constant 0 : i32
    %c0_i32_1 = arith.constant 0 : i32
    return %c0_i32, %c0_i32_0 : i32, i32
  }
  func.func @transform_2(%arg0: i32) -> (i32, i32) {
    %c0_i32 = arith.constant 0 : i32
    %c0_i32_0 = arith.constant 0 : i32
    %c0_i32_1 = arith.constant 0 : i32
    return %c0_i32, %c0_i32_0 : i32, i32
  }
  func.func @transform_3(%arg0: i32) -> (i32, i32) {
    %c0_i32 = arith.constant 0 : i32
    %c0_i32_0 = arith.constant 0 : i32
    %c0_i32_1 = arith.constant 0 : i32
    return %c0_i32, %c0_i32_0 : i32, i32
  }
  func.func @transform_4(%arg0: i32) -> (i32, i32) {
    %c0_i32 = arith.constant 0 : i32
    %c0_i32_0 = arith.constant 0 : i32
    %c0_i32_1 = arith.constant 0 : i32
    return %c0_i32, %c0_i32_0 : i32, i32
  }
  func.func @transform_5(%arg0: i32) -> (i32, i32) {
    %c0_i32 = arith.constant 0 : i32
    %c0_i32_0 = arith.constant 0 : i32
    %c0_i32_1 = arith.constant 0 : i32
    return %c0_i32, %c0_i32_0 : i32, i32
  }
  func.func @transform_6(%arg0: i32) -> (i32, i32) {
    %c0_i32 = arith.constant 0 : i32
    %c0_i32_0 = arith.constant 0 : i32
    %c0_i32_1 = arith.constant 0 : i32
    return %c0_i32, %c0_i32_0 : i32, i32
  }
  func.func @transform_7(%arg0: i32) -> (i32, i32) {
    %c0_i32 = arith.constant 0 : i32
    %c0_i32_0 = arith.constant 0 : i32
    %c0_i32_1 = arith.constant 0 : i32
    return %c0_i32, %c0_i32_0 : i32, i32
  }
  func.func @transform_8(%arg0: i32) -> (i32, i32) {
    %c0_i32 = arith.constant 0 : i32
    %c0_i32_0 = arith.constant 0 : i32
    %c0_i32_1 = arith.constant 0 : i32
    return %c0_i32, %c0_i32_0 : i32, i32
  }
  func.func @transform_9(%arg0: i32) -> (i32, i32) {
    %c0_i32 = arith.constant 0 : i32
    %c0_i32_0 = arith.constant 0 : i32
    return %arg0, %c0_i32 : i32, i32
  }
}

</mosaic_0001>

<bundles_post_ra>
// kernel: tpu_custom_call.1
= control target key start
LH: loop header
LB: loop body
LE: loop exit
PB: predicated region body
PF: predicated region fallthrough
CT: control target
= control target key end

     0   :  { %14 = vsyncpa [#allocation3], 0  ;;  %s872_s0 = inlined_call_operand.vmem [shape: f32[16,16], index: 0, kind: input, shape index: {}]   ;;  %s873_s1 = inlined_call_operand.vmem [shape: f32[16,128], index: 1, kind: input, shape index: {}]   ;;  %s874_s2 = inlined_call_operand.vmem [shape: f32[1,128], index: 2, kind: input, shape index: {}]   ;;  %s875_s3 = inlined_call_operand.vmem [shape: f32[128,128], index: 3, kind: input, shape index: {}]   ;;  %s876_s4 = inlined_call_operand.vmem [shape: f32[1,128], index: 4, kind: input, shape index: {}]   ;;  %s877_s5 = inlined_call_operand.hbm [shape: f32[128,128], index: 5, kind: input, shape index: {}]   ;;  %s878_s6 = inlined_call_operand.vmem [shape: f32[1,128], index: 6, kind: input, shape index: {}]   ;;  %s879_s7 = inlined_call_operand.vmem [shape: f32[128,64], index: 7, kind: input, shape index: {}]   ;;  %s880_s8 = inlined_call_operand.vmem [shape: f32[1,64], index: 8, kind: input, shape index: {}]   ;;  %s881_s9 = inlined_call_operand.hbm [shape: f32[16,64], index: 9, kind: output, shape index: {}]  }
   0x1   :  { %15 = vsyncpa [#allocation4], 0  ;;  %s684_s30 = smov [#allocation2]  }
   0x2   :  { %s31_s10 = sshll.u32 %s684_s30, 4  ;;  %s32_s10 = int_to_ptr.vmem [resolvable:$true] %s31_s10 }
   0x3   :  { %s648_s11 = scalar_lea.vmem %s32_s10, 2048  ;;  %p653_p1 = scmp.lt.s32.totalorder %s32_s10, %s32_s10 }
   0x4   :  { %p649_p0 = scmp.ne.s32.totalorder %s32_s10, %s648_s11  ;;  %p654_p2 = scmp.lt.s32.totalorder %s648_s11, %s648_s11 }
   0x6   :  { %p655_p3 = por %p654_p2, %p653_p1 }
   0x8   :  { %p656_p4 = pnand %p655_p3, %p649_p0 }
   0xa   :  { %659 = shalt.err (!%p656_p4)
}
   0xb   :  { %s685_s12 = smov 128   ;;  %s686_s13 = smov 8  }
   0xc   :  { %37 = dma.hbm_to_vmem [thread:$0]  %s877_s5, 2048, %s32_s10, [#allocation3], %s685_s12, %s685_s12, %s686_s13  }
   0xd   :  { %680 = dma.done.wait [#allocation3], 2048  }
   0xe   :  { %681 = vsyncadd [#allocation3], 4294965248  ;;  %vm58_vm0 = vcmask 130048   ;;  %v50_v0 = vld [vmem:[%s873_s1 + $0x8] sm:$0xff]  ;;  %v49_v1 = vld [vmem:[%s873_s1] sm:$0xff]  ;;  %vm440_vm1 = vcmask 523264  }
   0xf   :  { %v47_v2 = vld [vmem:[%s872_s0] sm:$0xff]  ;;  %524 = vmatprep.subr.mxu0 %v50_v0  ;;  %v157_v3 = vld [vmem:[%s875_s3 + $0x78] sm:$0xff]  ;;  %v156_v4 = vld [vmem:[%s875_s3 + $0x70] sm:$0xff] }
  0x10   :  { %528 = vmatprep.mubr.msk.f32.mxu0 %vm58_vm0, %v47_v2  ;;  %525 = vmatpush3.msra.mxu0 %v50_v0  ;;  %v48_v5 = vld [vmem:[%s872_s0 + $0x8] sm:$0xff]  ;;  %v154_v7 = vld [vmem:[%s875_s3 + $0x60] sm:$0xff]  ;;  %v153_v8 = vld [vmem:[%s875_s3 + $0x58] sm:$0xff] }
  0x11   :  { %531 = vmatprep.subr.mxu1 %v157_v3  ;;  %526 = vmatprep.subr.mxu0 %v49_v1  ;;  %v155_v6 = vld [vmem:[%s875_s3 + $0x68] sm:$0xff]  ;;  %v152_v9 = vld [vmem:[%s875_s3 + $0x50] sm:$0xff]  ;;  %v150_v11 = vld [vmem:[%s875_s3 + $0x40] sm:$0xff] }
  0x12   :  { %532 = vmatpush3.msra.mxu1 %v157_v3  ;;  %527 = vmatpush3.msra.mxu0 %v49_v1  ;;  %v151_v10 = vld [vmem:[%s875_s3 + $0x48] sm:$0xff]  ;;  %v149_v12 = vld [vmem:[%s875_s3 + $0x38] sm:$0xff]  ;;  %v148_v13 = vld [vmem:[%s875_s3 + $0x30] sm:$0xff] }
  0x13   :  { %533 = vmatprep.subr.mxu1 %v156_v4  ;;  %529 = vmatmul.mubr.msk.f32.vlgmr.msra.gmra.mxu0 %vm58_vm0, %v48_v5  ;;  %v147_v14 = vld [vmem:[%s875_s3 + $0x28] sm:$0xff]  ;;  %v146_v15 = vld [vmem:[%s875_s3 + $0x20] sm:$0xff]  ;;  %v145_v16 = vld [vmem:[%s875_s3 + $0x18] sm:$0xff] }
  0x14   :  { %534 = vmatpush3.msra.mxu1 %v156_v4  ;;  %v144_v17 = vld [vmem:[%s875_s3 + $0x10] sm:$0xff]  ;;  %v143_v18 = vld [vmem:[%s875_s3 + $0x8] sm:$0xff]  ;;  %v142_v19 = vld [vmem:[%s875_s3] sm:$0xff] }
  0x15   :  { %535 = vmatprep.subr.mxu1 %v155_v6  ;;  %v257_v20 = vld [vmem:[#allocation2 + $0x78] sm:$0xff]  ;;  %v256_v21 = vld [vmem:[#allocation2 + $0x70] sm:$0xff]  ;;  %v255_v22 = vld [vmem:[#allocation2 + $0x68] sm:$0xff] }
  0x16   :  { %536 = vmatpush3.msra.mxu1 %v155_v6  ;;  %566 = vmatprep.subr.mxu0 %v257_v20  ;;  %v254_v23 = vld [vmem:[#allocation2 + $0x60] sm:$0xff]  ;;  %v253_v24 = vld [vmem:[#allocation2 + $0x58] sm:$0xff]  ;;  %v252_v25 = vld [vmem:[#allocation2 + $0x50] sm:$0xff] }
  0x17   :  { %537 = vmatprep.subr.mxu1 %v154_v7  ;;  %567 = vmatpush3.msra.mxu0 %v257_v20  ;;  %v251_v26 = vld [vmem:[#allocation2 + $0x48] sm:$0xff]  ;;  %v250_v27 = vld [vmem:[#allocation2 + $0x40] sm:$0xff]  ;;  %v249_v28 = vld [vmem:[#allocation2 + $0x38] sm:$0xff] }
  0x18   :  { %538 = vmatpush3.msra.mxu1 %v154_v7  ;;  %568 = vmatprep.subr.mxu0 %v256_v21  ;;  %v248_v29 = vld [vmem:[#allocation2 + $0x30] sm:$0xff]  ;;  %v247_v30 = vld [vmem:[#allocation2 + $0x28] sm:$0xff]  ;;  %v246_v31 = vld [vmem:[#allocation2 + $0x20] sm:$0xff] }
  0x19   :  { %539 = vmatprep.subr.mxu1 %v153_v8  ;;  %569 = vmatpush3.msra.mxu0 %v256_v21  ;;  %v460_v32 = vld [vmem:[%s874_s2] ss:$0 sm:$0xff]  ;;  %v245_v39 = vld [vmem:[#allocation2 + $0x18] sm:$0xff]  ;;  %v244_v40 = vld [vmem:[#allocation2 + $0x10] sm:$0xff] }
  0x1a   :  { %540 = vmatpush3.msra.mxu1 %v153_v8  ;;  %570 = vmatprep.subr.mxu0 %v255_v22  ;;  %v243_v41 = vld [vmem:[#allocation2 + $0x8] sm:$0xff]  ;;  %v242_v42 = vld [vmem:[#allocation2] sm:$0xff]  ;;  %v357_v43 = vld [vmem:[%s879_s7 + $0x78] sm:$0xff] }
  0x1b   :  { %541 = vmatprep.subr.mxu1 %v152_v9  ;;  %571 = vmatpush3.msra.mxu0 %v255_v22  ;;  %v356_v44 = vld [vmem:[%s879_s7 + $0x70] sm:$0xff]  ;;  %v355_v45 = vld [vmem:[%s879_s7 + $0x68] sm:$0xff]  ;;  %v354_v46 = vld [vmem:[%s879_s7 + $0x60] sm:$0xff] }
  0x1c   :  { %542 = vmatpush3.msra.mxu1 %v152_v9  ;;  %572 = vmatprep.subr.mxu0 %v254_v23  ;;  %v353_v47 = vld [vmem:[%s879_s7 + $0x58] sm:$0xff]  ;;  %v352_v48 = vld [vmem:[%s879_s7 + $0x50] sm:$0xff]  ;;  %v351_v49 = vld [vmem:[%s879_s7 + $0x48] sm:$0xff] }
  0x1d   :  { %543 = vmatprep.subr.mxu1 %v151_v10  ;;  %573 = vmatpush3.msra.mxu0 %v254_v23  ;;  %v350_v50 = vld [vmem:[%s879_s7 + $0x40] sm:$0xff]  ;;  %v349_v51 = vld [vmem:[%s879_s7 + $0x38] sm:$0xff]  ;;  %v348_v52 = vld [vmem:[%s879_s7 + $0x30] sm:$0xff] }
  0x1e   :  { %544 = vmatpush3.msra.mxu1 %v151_v10  ;;  %574 = vmatprep.subr.mxu0 %v253_v24  ;;  %v347_v53 = vld [vmem:[%s879_s7 + $0x28] sm:$0xff]  ;;  %v346_v54 = vld [vmem:[%s879_s7 + $0x20] sm:$0xff]  ;;  %v345_v62 = vld [vmem:[%s879_s7 + $0x18] sm:$0xff] }
  0x1f   :  { %545 = vmatprep.subr.mxu1 %v150_v11  ;;  %575 = vmatpush3.msra.mxu0 %v253_v24  ;;  %v463_v55 = vld [vmem:[%s876_s4] ss:$0 sm:$0xff]  ;;  %v344_v63 = vld [vmem:[%s879_s7 + $0x10] sm:$0xff]  ;;  %v343_v0 = vld [vmem:[%s879_s7 + $0x8] sm:$0xff] }
  0x20   :  { %546 = vmatpush3.msra.mxu1 %v150_v11  ;;  %576 = vmatprep.subr.mxu0 %v252_v25  ;;  %v342_v1 = vld [vmem:[%s879_s7] sm:$0xff]  ;;  %s687_s7 = smov [#allocation5]  }
  0x21   :  { %547 = vmatprep.subr.mxu1 %v149_v12  ;;  %577 = vmatpush3.msra.mxu0 %v252_v25  ;;  %v464_v2 = vld [vmem:[%s878_s6] ss:$0 sm:$0xff]  ;;  %s448_s24 = sshll.u32 %s687_s7, 4  ;;  %s449_s24 = int_to_ptr.vmem [resolvable:$true] %s448_s24 }
  0x22   :  { %548 = vmatpush3.msra.mxu1 %v149_v12  ;;  %578 = vmatprep.subr.mxu0 %v251_v26  ;;  %v465_v9 = vld [vmem:[%s880_s8] ss:$0 sm:$0xff]  ;;  %s660_s6 = scalar_lea.vmem %s449_s24, 256  ;;  %p665_p6 = scmp.lt.s32.totalorder %s449_s24, %s449_s24 }
  0x23   :  { %549 = vmatprep.subr.mxu1 %v148_v13  ;;  %579 = vmatpush3.msra.mxu0 %v251_v26  ;;  %p661_p5 = scmp.ne.s32.totalorder %s449_s24, %s660_s6  ;;  %p666_p7 = scmp.lt.s32.totalorder %s660_s6, %s660_s6 }
  0x24   :  { %550 = vmatpush3.msra.mxu1 %v148_v13  ;;  %580 = vmatprep.subr.mxu0 %v250_v27 }
  0x25   :  { %551 = vmatprep.subr.mxu1 %v147_v14  ;;  %581 = vmatpush3.msra.mxu0 %v250_v27  ;;  %p667_p8 = por %p666_p7, %p665_p6 }
  0x26   :  { %552 = vmatpush3.msra.mxu1 %v147_v14  ;;  %582 = vmatprep.subr.mxu0 %v249_v28 }
  0x27   :  { %553 = vmatprep.subr.mxu1 %v146_v15  ;;  %583 = vmatpush3.msra.mxu0 %v249_v28  ;;  %p668_p9 = pnand %p667_p8, %p661_p5 }
  0x28   :  { %554 = vmatpush3.msra.mxu1 %v146_v15  ;;  %584 = vmatprep.subr.mxu0 %v248_v29 }
  0x29   :  { %555 = vmatprep.subr.mxu1 %v145_v16  ;;  %585 = vmatpush3.msra.mxu0 %v248_v29 }
  0x2a   :  { %556 = vmatpush3.msra.mxu1 %v145_v16  ;;  %586 = vmatprep.subr.mxu0 %v247_v30 }
  0x2b   :  { %557 = vmatprep.subr.mxu1 %v144_v17  ;;  %587 = vmatpush3.msra.mxu0 %v247_v30 }
  0x2c   :  { %558 = vmatpush3.msra.mxu1 %v144_v17  ;;  %588 = vmatprep.subr.mxu0 %v246_v31 }
  0x2d   :  { %559 = vmatprep.subr.mxu1 %v143_v18  ;;  %589 = vmatpush3.msra.mxu0 %v246_v31 }
  0x2e   :  { %560 = vmatpush3.msra.mxu1 %v143_v18  ;;  %590 = vmatprep.subr.mxu0 %v245_v39 }
  0x2f   :  { %561 = vmatprep.subr.mxu1 %v142_v19  ;;  %591 = vmatpush3.msra.mxu0 %v245_v39 }
  0x30   :  { %562 = vmatpush3.msra.mxu1 %v142_v19  ;;  %592 = vmatprep.subr.mxu0 %v244_v40 }
  0x31   :  { %593 = vmatpush3.msra.mxu0 %v244_v40  ;;  %601 = vmatprep.subr.mxu1 %v357_v43 }
  0x32   :  { %594 = vmatprep.subr.mxu0 %v243_v41 }
  0x33   :  { %595 = vmatpush3.msra.mxu0 %v243_v41 }
  0x34   :  { %596 = vmatprep.subr.mxu0 %v242_v42 }
  0x35   :  { %597 = vmatpush3.msra.mxu0 %v242_v42 }
  0xd3   :  { %v530_v33 = vpop.f32.mrf.mxu0 }
  0xd4   :  { %v137_v34 = vadd.f32 %v530_v33, %v460_v32 }
  0xd5   :  { %v131_v35 = vpop.f32.mrf.mxu0 }
  0xd6   :  { %v132_v36 = vadd.f32 %v460_v32, %v131_v35  ;;  %v141_v38 = vmax.f32 %v137_v34, 0.0 }
  0xd8   :  { %v140_v37 = vmax.f32 %v132_v36, 0.0 }
  0xda   :  { %563 = vmatprep.mubr.f32.mxu1 %v140_v37 }
  0xdb   :  { %564 = vmatmul.mubr.f32.vlgmr.msra.gmra.mxu1 %v141_v38 }
  0xdc   :  { %602 = vmatpush3.msra.mxu1 %v357_v43 }
  0xdd   :  { %603 = vmatprep.subr.mxu1 %v356_v44 }
  0xde   :  { %604 = vmatpush3.msra.mxu1 %v356_v44 }
  0xdf   :  { %605 = vmatprep.subr.mxu1 %v355_v45 }
  0xe0   :  { %606 = vmatpush3.msra.mxu1 %v355_v45 }
  0xe1   :  { %607 = vmatprep.subr.mxu1 %v354_v46 }
  0xe2   :  { %608 = vmatpush3.msra.mxu1 %v354_v46 }
  0xe3   :  { %609 = vmatprep.subr.mxu1 %v353_v47 }
  0xe4   :  { %610 = vmatpush3.msra.mxu1 %v353_v47 }
  0xe5   :  { %611 = vmatprep.subr.mxu1 %v352_v48 }
  0xe6   :  { %612 = vmatpush3.msra.mxu1 %v352_v48 }
  0xe7   :  { %613 = vmatprep.subr.mxu1 %v351_v49 }
  0xe8   :  { %614 = vmatpush3.msra.mxu1 %v351_v49 }
  0xe9   :  { %615 = vmatprep.subr.mxu1 %v350_v50 }
  0xea   :  { %616 = vmatpush3.msra.mxu1 %v350_v50 }
  0xeb   :  { %617 = vmatprep.subr.mxu1 %v349_v51 }
  0xec   :  { %618 = vmatpush3.msra.mxu1 %v349_v51 }
  0xed   :  { %619 = vmatprep.subr.mxu1 %v348_v52 }
  0xee   :  { %620 = vmatpush3.msra.mxu1 %v348_v52 }
  0xef   :  { %621 = vmatprep.subr.mxu1 %v347_v53 }
  0xf0   :  { %622 = vmatpush3.msra.mxu1 %v347_v53 }
  0xf1   :  { %623 = vmatprep.subr.mxu1 %v346_v54 }
  0xf2   :  { %624 = vmatpush3.msra.mxu1 %v346_v54 }
  0xf3   :  { %625 = vmatprep.subr.mxu1 %v345_v62 }
  0xf4   :  { %626 = vmatpush3.msra.mxu1 %v345_v62 }
  0xf5   :  { %627 = vmatprep.subr.mxu1 %v344_v63 }
  0xf6   :  { %628 = vmatpush3.msra.mxu1 %v344_v63 }
  0xf7   :  { %629 = vmatprep.subr.mxu1 %v343_v0 }
  0xf8   :  { %630 = vmatpush3.msra.mxu1 %v343_v0 }
  0xf9   :  { %631 = vmatprep.subr.mxu1 %v342_v1 }
  0xfa   :  { %632 = vmatpush3.msra.mxu1 %v342_v1 }
 0x19b   :  { %v565_v56 = vpop.f32.mrf.mxu1 }
 0x19c   :  { %v237_v57 = vadd.f32 %v565_v56, %v463_v55 }
 0x19d   :  { %v231_v58 = vpop.f32.mrf.mxu1 }
 0x19e   :  { %v232_v59 = vadd.f32 %v463_v55, %v231_v58  ;;  %v241_v61 = vmax.f32 %v237_v57, 0.0 }
 0x1a0   :  { %v240_v60 = vmax.f32 %v232_v59, 0.0 }
 0x1a2   :  { %598 = vmatprep.mubr.f32.mxu0 %v240_v60 }
 0x1a3   :  { %599 = vmatmul.mubr.f32.vlgmr.msra.gmra.mxu0 %v241_v61 }
 0x263   :  { %v600_v3 = vpop.f32.mrf.mxu0 }
 0x264   :  { %v337_v4 = vadd.f32 %v600_v3, %v464_v2 }
 0x265   :  { %v331_v5 = vpop.f32.mrf.mxu0 }
 0x266   :  { %v332_v6 = vadd.f32 %v464_v2, %v331_v5  ;;  %v341_v8 = vmax.f32 %v337_v4, 0.0 }
 0x268   :  { %v340_v7 = vmax.f32 %v332_v6, 0.0 }
 0x26a   :  { %633 = vmatprep.mubr.f32.mxu1 %v340_v7 }
 0x26b   :  { %634 = vmatmul.mubr.f32.vlgmr.msra.gmra.mxu1 %v341_v8 }
 0x32b   :  { %v635_v10 = vpop.f32.mrf.mxu1 }
 0x32c   :  { %v437_v11 = vadd.f32 %v635_v10, %v465_v9 }
 0x32d   :  { %v431_v12 = vpop.f32.mrf.mxu1 }
 0x32e   :  { %v432_v13 = vadd.f32 %v465_v9, %v431_v12  ;;  %442 = vst.msk [vmem:[#allocation5 + $0x8] sm:$0xff] %vm440_vm1, %v437_v11 }
 0x330   :  { %441 = vst.msk [vmem:[#allocation5] sm:$0xff] %vm440_vm1, %v432_v13 }
 0x331   :  { %671 = shalt.err (!%p668_p9)
}
 0x332   :  { %454 = dma.vmem_to_hbm [thread:$0]  %s449_s24, 256, %s881_s9, [#allocation4], %s685_s12, %s685_s12, %s686_s13  }
 0x333   :  { %682 = dma.done.wait [#allocation4], 256  }
 0x334   :  { %683 = vsyncadd [#allocation4], 4294967040 }
 0x335   :  { %458 = vsyncpa [#allocation3], 1 }
 0x336   :  { %459 = vsyncpa [#allocation4], 1 }

</bundles_post_ra>
